<compile_context>
chip_gen: v7x
topology: tpu7x:2x2x1
jax: 0.10.0
libtpu: 0.0.40
codegen_flags: <defaults>
</compile_context>

<pallas_src>
import jax
import jax.numpy as jnp
from jax import lax
from jax.experimental import pallas as pl
from jax.experimental.pallas import tpu as pltpu


def _row_tile(n, cap=512):
    """Largest tile (multiple of 8) dividing n, preferring >=2 grid steps."""
    cands = (512, 256, 128, 64, 32, 16, 8)
    for c in cands:
        if c <= cap and n % c == 0 and n // c >= 2:
            return c
    for c in cands:
        if c <= cap and n % c == 0:
            return c
    return n  # block == full dim is always legal


def _largest_div_tile(n, cap):
    """Largest multiple-of-8 divisor of n (n % 8 == 0) that is <= cap."""
    best, t = 8, 8
    while t <= min(n, cap):
        if n % t == 0:
            best = t
        t += 8
    return best


# ------------------ Kernel A: backbone MLP + exp_w projection ---------------
def backbone_kernel(x_ref, w1_ref, b1_ref, w2_ref, b2_ref, we_ref, f_ref, fp_ref):
    h = jnp.dot(x_ref[...], w1_ref[...], preferred_element_type=jnp.float32) + b1_ref[...]
    h = jax.nn.gelu(h, approximate=True)
    f = jnp.dot(h, w2_ref[...], preferred_element_type=jnp.float32) + b2_ref[...]
    f_ref[...] = f
    # project into aa-expansion space here so the A-expanded tensor never hits HBM
    fp_ref[...] = jnp.dot(f, we_ref[...], preferred_element_type=jnp.float32)


def run_backbone(x2, w1, b1, w2, b2, we):
    N, Din = x2.shape
    H = w1.shape[1]
    D = w2.shape[1]
    TR = _row_tile(N)
    const = lambda shape: pl.BlockSpec(shape, lambda i: (0,) * len(shape))
    return pl.pallas_call(
        backbone_kernel,
        out_shape=(jax.ShapeDtypeStruct((N, D), jnp.float32),
                   jax.ShapeDtypeStruct((N, D), jnp.float32)),
        grid_spec=pl.GridSpec(
            grid=(N // TR,),
            in_specs=[
                pl.BlockSpec((TR, Din), lambda i: (i, 0)),
                const((Din, H)), const((1, H)),
                const((H, D)), const((1, D)),
                const((D, D)),
            ],
            out_specs=[pl.BlockSpec((TR, D), lambda i: (i, 0)),
                       pl.BlockSpec((TR, D), lambda i: (i, 0))],
        ),
        compiler_params=pltpu.CompilerParams(dimension_semantics=("parallel",)),
    )(x2, w1, b1, w2, b2, we)


# ---------- Kernel B: aa expansion + gelu + fused lane-dense heads ----------
def expand_kernel(fp_ref, aa_ref, wh_ref, bh_ref, mut_ref, head_ref):
    # fp: (TR, D) residue rows, aa: (1, 1, D) projected aa embedding for this a
    mut = jax.nn.gelu(fp_ref[...] + aa_ref[0], approximate=True)          # (TR, D)
    mut_ref[0] = mut
    # single fused head: [ddg_single | e1 | e2 | pad] -> lane-dense (TR, P)
    head_ref[0] = (jnp.dot(mut, wh_ref[...], preferred_element_type=jnp.float32)
                   + bh_ref[...])


def run_expand(fp, aa_proj, w_head, b_head):
    N, D = fp.shape
    A = aa_proj.shape[0]
    P = w_head.shape[1]
    TR = _row_tile(N)
    return pl.pallas_call(
        expand_kernel,
        out_shape=(jax.ShapeDtypeStruct((A, N, D), jnp.float32),
                   jax.ShapeDtypeStruct((A, N, P), jnp.float32)),
        grid_spec=pl.GridSpec(
            grid=(N // TR, A),
            in_specs=[
                pl.BlockSpec((TR, D), lambda i, a: (i, 0)),      # resident across a
                pl.BlockSpec((1, 1, D), lambda i, a: (a, 0, 0)),
                pl.BlockSpec((D, P), lambda i, a: (0, 0)),       # weights resident
                pl.BlockSpec((1, P), lambda i, a: (0, 0)),
            ],
            out_specs=[pl.BlockSpec((1, TR, D), lambda i, a: (a, i, 0)),
                       pl.BlockSpec((1, TR, P), lambda i, a: (a, i, 0))],
        ),
        compiler_params=pltpu.CompilerParams(
            dimension_semantics=("parallel", "parallel")),
    )(fp, aa_proj, w_head, b_head)


# ------------- Kernel C: multi (pairwise) decoder — the hot path ------------
def multi_kernel(e1_ref, e2_ref, sc_ref, sr_ref, o_ref):
    e1 = e1_ref[0]                                   # (TM, Dz)
    e2 = e2_ref[0]                                   # (TN, Dz)
    # contract last dims -> no XLU transpose of e2
    epi = lax.dot_general(e1, e2, (((1,), (1,)), ((), ())),
                          preferred_element_type=jnp.float32)   # (TM, TN)
    # s_col/s_row precomputed in wrapper -> no in-kernel cross-lane transpose
    o_ref[0] = sc_ref[0] + sr_ref[0] + epi


def run_multi(e1, e2, s):
    B, M, Dz = e1.shape

    if M % 128 == 0:
        # fully lane-dense tiling on both output dims
        TM = 256 if (M % 256 == 0 and M > 256) else min(M, 128)
        TN = next(c for c in (512, 256, 128) if M % c == 0)
        s_col = s                                    # (B, M, 1)
        s_row = s.reshape(B, 1, M)                   # (B, 1, M)
        return pl.pallas_call(
            multi_kernel,
            out_shape=jax.ShapeDtypeStruct((B, M, M), jnp.float32),
            grid_spec=pl.GridSpec(
                grid=(B, M // TM, M // TN),
                in_specs=[
                    pl.BlockSpec((1, TM, Dz), lambda b, i, j: (b, i, 0)),
                    pl.BlockSpec((1, TN, Dz), lambda b, i, j: (b, j, 0)),
                    pl.BlockSpec((1, TM, 1), lambda b, i, j: (b, i, 0)),
                    pl.BlockSpec((1, 1, TN), lambda b, i, j: (b, 0, j)),
                ],
                out_specs=pl.BlockSpec((1, TM, TN), lambda b, i, j: (b, i, j)),
            ),
            compiler_params=pltpu.CompilerParams(
                dimension_semantics=("parallel", "parallel", "parallel")),
        )(e1, e2, s_col, s_row)

    # M not a multiple of 128: keep the column dim at the full M (block == full
    # array dim is legal; only tail lanes use masked stores) instead of padding
    # both dims to 128 and wasting ~(Mp/M)^2 compute + pad/slice HBM traffic.
    Mr = ((M + 7) // 8) * 8
    if Mr != M:
        rpad = ((0, 0), (0, Mr - M), (0, 0))
        e1r = jnp.pad(e1, rpad)
        s_col = jnp.pad(s, rpad)
    else:
        e1r, s_col = e1, s
    s_row = s.reshape(B, 1, M)
    cap = max(8, min(1024, (2 << 20) // (4 * M)))    # keep out block <= ~2 MiB
    TM = _largest_div_tile(Mr, cap)
    out = pl.pallas_call(
        multi_kernel,
        out_shape=jax.ShapeDtypeStruct((B, Mr, M), jnp.float32),
        grid_spec=pl.GridSpec(
            grid=(B, Mr // TM),
            in_specs=[
                pl.BlockSpec((1, TM, Dz), lambda b, i: (b, i, 0)),
                pl.BlockSpec((1, M, Dz), lambda b, i: (b, 0, 0)),   # resident per b
                pl.BlockSpec((1, TM, 1), lambda b, i: (b, i, 0)),
                pl.BlockSpec((1, 1, M), lambda b, i: (b, 0, 0)),
            ],
            out_specs=pl.BlockSpec((1, TM, M), lambda b, i: (b, i, 0)),
        ),
        compiler_params=pltpu.CompilerParams(
            dimension_semantics=("parallel", "parallel")),
    )(e1r, e2, s_col, s_row)
    return out[:, :M, :] if Mr != M else out


# ----------------------------- full forward ---------------------------------
def mutate_everything_forward(x, params):
    B, L, Din = x.shape
    A, D = params["aa_embed"].shape
    Dz = params["w1z"].shape[1]
    N = B * L

    # wrapper-side weight folding (tiny, done once):
    #   (f + aa) @ W + b  ==  (f @ W) + (aa @ W + b)
    aa_proj = (params["aa_embed"] @ params["exp_w"] + params["exp_b"]).reshape(A, 1, D)
    # fused lane-dense head weight: [ws | w1z | w2z | zero-pad] -> (D, P)
    P = ((1 + 2 * Dz + 127) // 128) * 128
    w_head = jnp.zeros((D, P), jnp.float32)
    w_head = w_head.at[:, 0:1].set(params["ws"])
    w_head = w_head.at[:, 1:1 + Dz].set(params["w1z"])
    w_head = w_head.at[:, 1 + Dz:1 + 2 * Dz].set(params["w2z"])
    b_head = jnp.zeros((1, P), jnp.float32).at[:, 0:1].set(params["bs"])

    # backbone (+ exp_w projection)
    feats2, fp = run_backbone(x.reshape(N, Din),
                              params["bb_w1"], params["bb_b1"],
                              params["bb_w2"], params["bb_b2"],
                              params["exp_w"])                         # [N, D] each

    # aa expansion + fused single/epistasis heads
    mut_an, head_an = run_expand(fp, aa_proj, w_head, b_head)          # (A,N,D), (A,N,P)

    mut = jnp.transpose(mut_an, (1, 0, 2)).reshape(B, L, A, D)
    head = jnp.transpose(head_an, (1, 0, 2)).reshape(B, L * A, P)
    s = head[..., 0:1]                                                 # (B, M, 1)
    e1 = head[..., 1:1 + Dz]                                           # (B, M, Dz)
    e2 = head[..., 1 + Dz:1 + 2 * Dz]                                  # (B, M, Dz)

    return {
        "feats": feats2.reshape(B, L, D),
        "mut_feats": mut,
        "ddg_single": s.reshape(B, L, A),
        "ddg_double": run_multi(e1, e2, s),                            # (B, M, M)
    }


# ----------------------------- reference (pure JAX) --------------------------
def reference_forward(x, params):
    B, L, Din = x.shape
    A, D = params["aa_embed"].shape
    h = jax.nn.gelu(x.reshape(B * L, Din) @ params["bb_w1"] + params["bb_b1"],
                    approximate=True)
    feats2 = h @ params["bb_w2"] + params["bb_b2"]
    z = (feats2[:, None, :] + params["aa_embed"][None, :, :]).reshape(B * L * A, D)
    mut = jax.nn.gelu(z @ params["exp_w"] + params["exp_b"], approximate=True)
    s = mut @ params["ws"] + params["bs"]
    e1 = mut @ params["w1z"]
    e2 = mut @ params["w2z"]
    M = L * A
    Dz = e1.shape[-1]
    sb = s.reshape(B, M, 1)
    dd = sb + jnp.transpose(sb, (0, 2, 1)) + jnp.einsum(
        "bmd,bnd->bmn", e1.reshape(B, M, Dz), e2.reshape(B, M, Dz))
    return {
        "feats": feats2.reshape(B, L, D),
        "mut_feats": mut.reshape(B, L, A, D),
        "ddg_single": s.reshape(B, L, A),
        "ddg_double": dd,
    }


def init_params(key, Din=32, H=32, D=32, A=20, Dz=16):
    ks = jax.random.split(key, 10)
    sc = lambda fan: 1.0 / jnp.sqrt(jnp.float32(fan))
    return {
        "bb_w1": jax.random.normal(ks[0], (Din, H), jnp.float32) * sc(Din),
        "bb_b1": jax.random.normal(ks[1], (1, H), jnp.float32) * 0.02,
        "bb_w2": jax.random.normal(ks[2], (H, D), jnp.float32) * sc(H),
        "bb_b2": jax.random.normal(ks[3], (1, D), jnp.float32) * 0.02,
        "aa_embed": jax.random.normal(ks[4], (A, D), jnp.float32) * 0.1,
        "exp_w": jax.random.normal(ks[5], (D, D), jnp.float32) * sc(D),
        "exp_b": jax.random.normal(ks[6], (1, D), jnp.float32) * 0.02,
        "ws": jax.random.normal(ks[7], (D, 1), jnp.float32) * sc(D),
        "bs": jnp.zeros((1, 1), jnp.float32),
        "w1z": jax.random.normal(ks[8], (D, Dz), jnp.float32) * sc(D),
        "w2z": jax.random.normal(ks[9], (D, Dz), jnp.float32) * sc(D),
    }


if __name__ == "__main__":
    # Small shapes consistent with the module's forward: per-residue embeddings.
    B, L, Din = 2, 8, 32
    key = jax.random.PRNGKey(0)
    kx, kp = jax.random.split(key)
    x = jax.random.normal(kx, (B, L, Din), jnp.float32)
    params = init_params(kp)

    pred = mutate_everything_forward(x, params)
    pred = jax.tree_util.tree_map(jax.block_until_ready, pred)

    ref = reference_forward(x, params)
    for k in ref:
        # slightly loose tolerance: kernel uses the (mathematically identical)
        # distributed form f@W + (aa@W + b) instead of (f+aa)@W + b.
        assert jnp.allclose(pred[k], ref[k], atol=5e-4, rtol=5e-4), k

    # TODO(synk): the original create_backbone wraps a pretrained ESM/AlphaFold
    # encoder; here it is a deterministic synthetic MLP with the same interface.
    print("KERNEL_OK")
</pallas_src>

<mosaic_0001>
module attributes {stable_mosaic.version = 11 : i64} {
  func.func @backbone_kernel(%arg0: i32, %arg1: memref<8x32xf32, #tpu.memory_space<vmem>>, %arg2: memref<32x32xf32, #tpu.memory_space<vmem>>, %arg3: memref<1x32xf32, #tpu.memory_space<vmem>>, %arg4: memref<32x32xf32, #tpu.memory_space<vmem>>, %arg5: memref<1x32xf32, #tpu.memory_space<vmem>>, %arg6: memref<32x32xf32, #tpu.memory_space<vmem>>, %arg7: memref<8x32xf32, #tpu.memory_space<vmem>>, %arg8: memref<8x32xf32, #tpu.memory_space<vmem>>) attributes {dimension_semantics = [#tpu.dimension_semantics<parallel>], iteration_bounds = array<i64: 2>, scalar_prefetch = 0 : i64, scratch_operands = 0 : i64, tpu.core_type = #tpu.core_type<tc>, window_params = [{transform_indices = @transform_0, window_bounds = array<i64: 8, 32>}, {pipeline_mode = #tpu.pipeline_mode<synchronous>, transform_indices = @transform_1, window_bounds = array<i64: 32, 32>}, {pipeline_mode = #tpu.pipeline_mode<synchronous>, transform_indices = @transform_2, window_bounds = array<i64: 1, 32>}, {pipeline_mode = #tpu.pipeline_mode<synchronous>, transform_indices = @transform_3, window_bounds = array<i64: 32, 32>}, {pipeline_mode = #tpu.pipeline_mode<synchronous>, transform_indices = @transform_4, window_bounds = array<i64: 1, 32>}, {pipeline_mode = #tpu.pipeline_mode<synchronous>, transform_indices = @transform_5, window_bounds = array<i64: 32, 32>}, {transform_indices = @transform_6, window_bounds = array<i64: 8, 32>}, {transform_indices = @transform_7, window_bounds = array<i64: 8, 32>}]} {
    %c0 = arith.constant 0 : index
    %c0_0 = arith.constant 0 : index
    %0 = vector.load %arg1[%c0, %c0_0] : memref<8x32xf32, #tpu.memory_space<vmem>>, vector<8x32xf32>
    %c0_1 = arith.constant 0 : index
    %c0_2 = arith.constant 0 : index
    %1 = vector.load %arg2[%c0_1, %c0_2] : memref<32x32xf32, #tpu.memory_space<vmem>>, vector<32x32xf32>
    %cst = arith.constant dense<0.000000e+00> : vector<8x32xf32>
    %2 = tpu.matmul %0, %1, %cst {dimension_numbers = #tpu.dot_dimension_numbers<[1], [0], [0], [1], [0, 0, 1, 1], [], []>} : vector<8x32xf32>, vector<32x32xf32>, vector<8x32xf32> -> vector<8x32xf32>
    %c0_3 = arith.constant 0 : index
    %c0_4 = arith.constant 0 : index
    %3 = vector.load %arg3[%c0_3, %c0_4] : memref<1x32xf32, #tpu.memory_space<vmem>>, vector<1x32xf32>
    %4 = vector.broadcast %3 : vector<1x32xf32> to vector<8x32xf32>
    %5 = arith.addf %2, %4 : vector<8x32xf32>
    %6 = arith.mulf %5, %5 : vector<8x32xf32>
    %7 = arith.mulf %5, %6 : vector<8x32xf32>
    %cst_5 = arith.constant 4.471500e-02 : f32
    %8 = vector.broadcast %cst_5 : f32 to vector<8x32xf32>
    %9 = arith.mulf %8, %7 : vector<8x32xf32>
    %10 = arith.addf %5, %9 : vector<8x32xf32>
    %cst_6 = arith.constant 0.797884583 : f32
    %11 = vector.broadcast %cst_6 : f32 to vector<8x32xf32>
    %12 = arith.mulf %11, %10 : vector<8x32xf32>
    %13 = math.tanh %12 : vector<8x32xf32>
    %cst_7 = arith.constant 1.000000e+00 : f32
    %14 = vector.broadcast %cst_7 : f32 to vector<8x32xf32>
    %15 = arith.addf %14, %13 : vector<8x32xf32>
    %cst_8 = arith.constant 5.000000e-01 : f32
    %16 = vector.broadcast %cst_8 : f32 to vector<8x32xf32>
    %17 = arith.mulf %16, %15 : vector<8x32xf32>
    %18 = arith.mulf %5, %17 : vector<8x32xf32>
    %c0_9 = arith.constant 0 : index
    %c0_10 = arith.constant 0 : index
    %19 = vector.load %arg4[%c0_9, %c0_10] : memref<32x32xf32, #tpu.memory_space<vmem>>, vector<32x32xf32>
    %cst_11 = arith.constant dense<0.000000e+00> : vector<8x32xf32>
    %20 = tpu.matmul %18, %19, %cst_11 {dimension_numbers = #tpu.dot_dimension_numbers<[1], [0], [0], [1], [0, 0, 1, 1], [], []>} : vector<8x32xf32>, vector<32x32xf32>, vector<8x32xf32> -> vector<8x32xf32>
    %c0_12 = arith.constant 0 : index
    %c0_13 = arith.constant 0 : index
    %21 = vector.load %arg5[%c0_12, %c0_13] : memref<1x32xf32, #tpu.memory_space<vmem>>, vector<1x32xf32>
    %22 = vector.broadcast %21 : vector<1x32xf32> to vector<8x32xf32>
    %23 = arith.addf %20, %22 : vector<8x32xf32>
    %c0_14 = arith.constant 0 : index
    %c0_15 = arith.constant 0 : index
    %24 = vector.load %arg7[%c0_14, %c0_15] : memref<8x32xf32, #tpu.memory_space<vmem>>, vector<8x32xf32>
    tpu.vector_store %arg7[%c0_14, %c0_15], %23 {strides = array<i32>} : memref<8x32xf32, #tpu.memory_space<vmem>>, vector<8x32xf32>,
    %c0_16 = arith.constant 0 : index
    %c0_17 = arith.constant 0 : index
    %25 = vector.load %arg6[%c0_16, %c0_17] : memref<32x32xf32, #tpu.memory_space<vmem>>, vector<32x32xf32>
    %cst_18 = arith.constant dense<0.000000e+00> : vector<8x32xf32>
    %26 = tpu.matmul %23, %25, %cst_18 {dimension_numbers = #tpu.dot_dimension_numbers<[1], [0], [0], [1], [0, 0, 1, 1], [], []>} : vector<8x32xf32>, vector<32x32xf32>, vector<8x32xf32> -> vector<8x32xf32>
    %c0_19 = arith.constant 0 : index
    %c0_20 = arith.constant 0 : index
    %27 = vector.load %arg8[%c0_19, %c0_20] : memref<8x32xf32, #tpu.memory_space<vmem>>, vector<8x32xf32>
    tpu.vector_store %arg8[%c0_19, %c0_20], %26 {strides = array<i32>} : memref<8x32xf32, #tpu.memory_space<vmem>>, vector<8x32xf32>,
    return
  }
  func.func @transform_0(%arg0: i32) -> (i32, i32) {
    %c0_i32 = arith.constant 0 : i32
    %c0_i32_0 = arith.constant 0 : i32
    return %arg0, %c0_i32 : i32, i32
  }
  func.func @transform_1(%arg0: i32) -> (i32, i32) {
    %c0_i32 = arith.constant 0 : i32
    %c0_i32_0 = arith.constant 0 : i32
    %c0_i32_1 = arith.constant 0 : i32
    return %c0_i32, %c0_i32_0 : i32, i32
  }
  func.func @transform_2(%arg0: i32) -> (i32, i32) {
    %c0_i32 = arith.constant 0 : i32
    %c0_i32_0 = arith.constant 0 : i32
    %c0_i32_1 = arith.constant 0 : i32
    return %c0_i32, %c0_i32_0 : i32, i32
  }
  func.func @transform_3(%arg0: i32) -> (i32, i32) {
    %c0_i32 = arith.constant 0 : i32
    %c0_i32_0 = arith.constant 0 : i32
    %c0_i32_1 = arith.constant 0 : i32
    return %c0_i32, %c0_i32_0 : i32, i32
  }
  func.func @transform_4(%arg0: i32) -> (i32, i32) {
    %c0_i32 = arith.constant 0 : i32
    %c0_i32_0 = arith.constant 0 : i32
    %c0_i32_1 = arith.constant 0 : i32
    return %c0_i32, %c0_i32_0 : i32, i32
  }
  func.func @transform_5(%arg0: i32) -> (i32, i32) {
    %c0_i32 = arith.constant 0 : i32
    %c0_i32_0 = arith.constant 0 : i32
    %c0_i32_1 = arith.constant 0 : i32
    return %c0_i32, %c0_i32_0 : i32, i32
  }
  func.func @transform_6(%arg0: i32) -> (i32, i32) {
    %c0_i32 = arith.constant 0 : i32
    %c0_i32_0 = arith.constant 0 : i32
    return %arg0, %c0_i32 : i32, i32
  }
  func.func @transform_7(%arg0: i32) -> (i32, i32) {
    %c0_i32 = arith.constant 0 : i32
    %c0_i32_0 = arith.constant 0 : i32
    return %arg0, %c0_i32 : i32, i32
  }
}

</mosaic_0001>

<bundles_post_ra>
// kernel: tpu_custom_call.1
= control target key start
LH: loop header
LB: loop body
LE: loop exit
PB: predicated region body
PF: predicated region fallthrough
CT: control target
= control target key end

     0   :  { %13 = vsyncpa [#allocation3], 0  ;;  %s1533_s0 = inlined_call_operand.hbm [shape: f32[16,32], index: 0, kind: input, shape index: {}]   ;;  %s1534_s1 = inlined_call_operand.hbm [shape: f32[32,32], index: 1, kind: input, shape index: {}]   ;;  %s1535_s2 = inlined_call_operand.vmem [shape: f32[1,32], index: 2, kind: input, shape index: {}]   ;;  %s1536_s3 = inlined_call_operand.hbm [shape: f32[32,32], index: 3, kind: input, shape index: {}]   ;;  %s1537_s4 = inlined_call_operand.vmem [shape: f32[1,32], index: 4, kind: input, shape index: {}]   ;;  %s1538_s5 = inlined_call_operand.hbm [shape: f32[32,32], index: 5, kind: input, shape index: {}]   ;;  %s1539_s6 = inlined_call_operand.hbm [shape: f32[16,32], index: 6, kind: output, shape index: {0}]   ;;  %s1540_s7 = inlined_call_operand.hbm [shape: f32[16,32], index: 7, kind: output, shape index: {1}]  }
   0x1   :  { %15 = vsyncpa [#allocation3 + $0x1], 0 }
   0x2   :  { %16 = vsyncpa [#allocation6], 0 }
   0x3   :  { %17 = vsyncpa [#allocation9], 0 }
   0x4   :  { %18 = vsyncpa [#allocation4], 0 }
   0x5   :  { %20 = vsyncpa [#allocation4 + $0x1], 0 }
   0x6   :  { %21 = vsyncpa [#allocation12], 0 }
   0x7   :  { %23 = vsyncpa [#allocation12 + $0x1], 0  ;;  %s1224_s24 = smov 0   ;;  %s1226_s25 = smov 0  }
   0x8   :  { %s1228_s26 = smov 0   ;;  %s1230_s27 = smov 0  }
   0x9 LB: > { %s1245_s28 = sadd.s32 4294967295, %s1171_s27   ;;  %s770_s29 = sadd.s32 4294967294, %s1171_s27   ;;  %s1171_s27 = sphi %s1230_s27, %s1566_s27   ;;  %s1167_s26 = sphi %s1228_s26, %s1565_s26   ;;  %s1163_s25 = sphi %s1226_s25, %s1564_s25   ;;  %s1159_s24 = sphi %s1224_s24, %s1563_s24  }
   0xa   : > { %p49_p0 = scmp.ne.s32.totalorder %s1163_s25, %s1159_s24  ;;  %p1541_p1 = scmp.eq.s32.totalorder %s1245_s28, 0 }
   0xb   : > { %p184_p3 = scmp.eq.s32.totalorder %s770_s29, 1  ;;  %p771_p5 = scmp.ge.s32.totalorder %s1171_s27, 1 }
   0xc   : > { %p1254_p4 = por %p1541_p1, %p49_p0  ;;  %p217_p7 = scmp.lt.s32.totalorder %s1171_s27, 3 }
   0xd   : > { %p1259_p6 = por %p184_p3, %p49_p0  ;;  %s1173_s10 = smov [#allocation5]  }
   0xe   : > { %s1545_s30 = scalar_select %p1254_p4, 1, 0 }
   0xf   : > { %s1546_s8 = scalar_select %p1259_p6, 1, 0 }
  0x10   : > { %p1264_p8 = pnand %p771_p5, %p217_p7  ;;  %s229_s11 = sshll.u32 %s1173_s10, 4  ;;  %s1268_s11 = int_to_ptr.vmem [resolvable:$true] %s229_s11 }
  0x11   : > { %1547 = sst [smem:[#allocation18_spill]] %s1546_s8  ;;  %s1174_s13 = smov [#allocation7]  }
  0x12   : > { %s1548_s9 = scalar_select %p1264_p8, 1, 0 }
  0x13   : > { %p880_p9 = pneg %p1264_p8  ;;  %s245_s14 = sshll.u32 %s1174_s13, 4  ;;  %s1279_s14 = int_to_ptr.vmem [resolvable:$true] %s245_s14 }
  0x14   : > { %s1175_s15 = smov [#allocation8]   ;;  %s951_s19 = scalar_lea.hbm %s1534_s1, 512 }
  0x15   : > { %p1275_p11 = pnand %p880_p9, %p1541_p1  ;;  %s1281_s16 = sshll.u32 %s1175_s15, 4  ;;  %s262_s16 = int_to_ptr.vmem [resolvable:$true] %s1281_s16 }
  0x16   : > { %p952_p12 = scmp.ne.s32.totalorder %s1534_s1, %s951_s19  ;;  %p958_p5 = scmp.lt.u32.totalorder %s951_s19, %s1534_s1 }
  0x17   : > { %p1291_p13 = pneg %p1275_p11 }
  0x19   : > { %p954_p0 = pnand %p1291_p13, %p952_p12 }
  0x1b   : > { %p955_p3 = pneg %p954_p0 }
  0x1d   : > { %p960_p7 = pnand %p958_p5, %p955_p3 }
  0x1f   : > { %963 = shalt.err (!%p960_p7)
}
  0x20   : > { %s964_s10 = scalar_lea.vmem %s1268_s11, 512  ;;  %p972_p2 = scmp.lt.s32.totalorder %s1268_s11, %s1268_s11 }
  0x21   : > { %p965_p9 = scmp.ne.s32.totalorder %s1268_s11, %s964_s10  ;;  %p973_p6 = scmp.lt.s32.totalorder %s964_s10, %s964_s10 }
  0x23   : > { %p967_p10 = pnand %p965_p9, %p1291_p13  ;;  %p974_p12 = por %p973_p6, %p972_p2 }
  0x25   : > { %p968_p1 = pneg %p967_p10 }
  0x27   : > { %p975_p0 = pnand %p974_p12, %p968_p1 }
  0x29   : > { %978 = shalt.err (!%p975_p0)
}
  0x2a   : > { %s1176_s13 = smov 128   ;;  %s1177_s15 = smov 8  }
  0x2b   : > { %883 = dma.hbm_to_vmem [thread:$0]  (!%p1275_p11), %s1534_s1, 512, %s1268_s11, [#allocation6], %s1176_s13, %s1176_s13, %s1177_s15  }
  0x2c   : > { %s979_s21 = scalar_lea.hbm %s1536_s3, 512 }
  0x2d   : > { %p980_p1 = scmp.ne.s32.totalorder %s1536_s3, %s979_s21  ;;  %p986_p10 = scmp.lt.u32.totalorder %s979_s21, %s1536_s3 }
  0x2f   : > { %p982_p2 = pnand %p980_p1, %p1291_p13 }
  0x31   : > { %p983_p6 = pneg %p982_p2 }
  0x33   : > { %p988_p3 = pnand %p986_p10, %p983_p6 }
  0x35   : > { %991 = shalt.err (!%p988_p3)
}
  0x36   : > { %s992_s11 = scalar_lea.vmem %s1279_s14, 512  ;;  %p1000_p12 = scmp.lt.s32.totalorder %s1279_s14, %s1279_s14 }
  0x37   : > { %p993_p5 = scmp.ne.s32.totalorder %s1279_s14, %s992_s11  ;;  %p1001_p0 = scmp.lt.s32.totalorder %s992_s11, %s992_s11 }
  0x39   : > { %p995_p7 = pnand %p993_p5, %p1291_p13  ;;  %p1002_p1 = por %p1001_p0, %p1000_p12 }
  0x3b   : > { %p996_p9 = pneg %p995_p7 }
  0x3d   : > { %p1003_p2 = pnand %p1002_p1, %p996_p9 }
  0x3f   : > { %1006 = shalt.err (!%p1003_p2)
}
  0x40   : > { %886 = dma.hbm_to_vmem [thread:$0]  (!%p1275_p11), %s1536_s3, 512, %s1279_s14, [#allocation6], %s1176_s13, %s1176_s13, %s1177_s15  }
  0x41   : > { %s1007_s20 = scalar_lea.hbm %s1538_s5, 512 }
  0x42   : > { %p1008_p6 = scmp.ne.s32.totalorder %s1538_s5, %s1007_s20  ;;  %p1014_p5 = scmp.lt.u32.totalorder %s1007_s20, %s1538_s5 }
  0x44   : > { %p1010_p10 = pnand %p1008_p6, %p1291_p13 }
  0x46   : > { %p1011_p3 = pneg %p1010_p10 }
  0x48   : > { %p1016_p7 = pnand %p1014_p5, %p1011_p3 }
  0x4a   : > { %1019 = shalt.err (!%p1016_p7)
}
  0x4b   : > { %s1020_s11 = scalar_lea.vmem %s262_s16, 512  ;;  %p1028_p1 = scmp.lt.s32.totalorder %s262_s16, %s262_s16 }
  0x4c   : > { %p1021_p9 = scmp.ne.s32.totalorder %s262_s16, %s1020_s11  ;;  %p1029_p2 = scmp.lt.s32.totalorder %s1020_s11, %s1020_s11 }
  0x4e   : > { %p1023_p12 = pnand %p1021_p9, %p1291_p13  ;;  %p1030_p4 = por %p1029_p2, %p1028_p1 }
  0x50   : > { %p1024_p0 = pneg %p1023_p12 }
  0x52   : > { %p1031_p8 = pnand %p1030_p4, %p1024_p0 }
  0x54   : > { %1034 = shalt.err (!%p1031_p8)
}
  0x55   : > { %889 = dma.hbm_to_vmem [thread:$0]  (!%p1275_p11), %s1538_s5, 512, %s262_s16, [#allocation9], %s1176_s13, %s1176_s13, %s1177_s15  }
  0x56   : > { %s1364_s22 = sadd.s32 1, %s1171_s27   ;;  %s36_s17 = sadd.s32 1, %s1167_s26 }
  0x57   : > { %s33_s12 = ssub.s32 %s1171_s27, %s1364_s22  ;;  %p43_p8 = scmp.ne.s32.totalorder %s1167_s26, %s1163_s25 }
  0x58   : > { %p34_p4 = scmp.eq.s32.totalorder %s33_s12, 0  ;;  %p44_p13 = scmp.eq.s32.totalorder %s1171_s27, 0 }
  0x59   : > { %p904_p6 = scmp.lt.s32.totalorder %s1171_s27, 2  ;;  %p1551_p3 = scmp.eq.s32.totalorder %s1245_s28, 1 }
  0x5a   : > { %s1374_s18 = scalar_select %p34_p4, %s1167_s26, %s36_s17  }
  0x5b   : > { %p45_p10 = por %p44_p13, %p43_p8  ;;  %p1378_p5 = por %p1551_p3, %p43_p8 }
  0x5c   : > { %s275_s20 = sand.u32 1, %s1167_s26   ;;  %s777_s21 = sshll.u32 %s1171_s27, 7 }
  0x5d   : > { %s776_s16 = sshll.u32 %s275_s20, 3  ;;  %s1387_s23 = scalar_lea.hbm %s1533_s0, %s777_s21 }
  0x5e   : > { %s279_s29 = scalar_lea.vmem [#allocation2], %s776_s16  ;;  %p1389_p11 = pnand %p904_p6, %p45_p10 }
  0x5f   : > { %s286_s10 = sshll.u32 %s279_s29, 4  ;;  %s276_s14 = scalar_lea.sflag [#allocation3], %s275_s20  ;;  %s1393_s10 = int_to_ptr.vmem [resolvable:$true] %s286_s10 }
  0x60   : > { %s1035_s8 = scalar_lea.hbm %s1387_s23, 128  ;;  %p1037_p9 = pneg %p1389_p11 }
  0x61   : > { %p1036_p7 = scmp.ne.s32.totalorder %s1387_s23, %s1035_s8  ;;  %s1040_s21 = scalar_lea.hbm %s1533_s0, 256 }
  0x62   : > { %p1041_p1 = scmp.lt.u32.totalorder %s1387_s23, %s1533_s0  ;;  %p1042_p2 = scmp.lt.u32.totalorder %s1040_s21, %s1035_s8 }
  0x63   : > { %p1038_p12 = pnand %p1037_p9, %p1036_p7  ;;  %p1044_p8 = scmp.lt.u32.totalorder %s1035_s8, %s1387_s23 }
  0x64   : > { %p1043_p4 = por %p1042_p2, %p1041_p1 }
  0x65   : > { %p1039_p0 = pneg %p1038_p12 }
  0x66   : > { %p1045_p13 = por %p1044_p8, %p1043_p4 }
  0x68   : > { %p1046_p6 = pnand %p1045_p13, %p1039_p0 }
  0x6a   : > { %1049 = shalt.err (!%p1046_p6)
}
  0x6b   : > { %s1050_s20 = scalar_lea.vmem %s1393_s10, 128  ;;  %s1178_s15 = smov [#allocation2]  }
  0x6c   : > { %p1051_p10 = scmp.ne.s32.totalorder %s1393_s10, %s1050_s20  ;;  %s1055_s29 = sshll.u32 %s1178_s15, 4  ;;  %s1056_s29 = int_to_ptr.vmem [resolvable:$false] %s1055_s29 }
  0x6d   : > { %s1057_s12 = scalar_lea.vmem %s1056_s29, 256  ;;  %p1058_p12 = scmp.lt.s32.totalorder %s1393_s10, %s1056_s29 }
  0x6e   : > { %p1053_p3 = pnand %p1051_p10, %p1037_p9  ;;  %p1059_p1 = scmp.lt.s32.totalorder %s1057_s12, %s1050_s20 }
  0x70   : > { %p1054_p7 = pneg %p1053_p3  ;;  %p1060_p2 = por %p1059_p1, %p1058_p12 }
  0x72   : > { %p1061_p4 = pnand %p1060_p2, %p1054_p7 }
  0x74   : > { %1064 = shalt.err (!%p1061_p4)
}
  0x75   : > { %893 = dma.hbm_to_vmem [thread:$0]  (!%p1389_p11), %s1387_s23, 128, %s1393_s10, %s276_s14  }
  0x76   : > { %p1554_p0 = scmp.ne.s32.totalorder %s1548_s9, 0 }
  0x77   : > { %s1423_s8 = sand.u32 (!%p1554_p0), 1, %s1163_s25   ;;  %p1555_p9 = scmp.ne.s32.totalorder (!%p1554_p0), %s1545_s30, 0 }
  0x78   : > { %295 = sbr.rel (%p1554_p0) target bundleno = 827 (0x33b), region = 44  ;;  %s1426_s17 = sshll.u32 (!%p1554_p0), %s1423_s8, 3 }
  0x79   : > { %s298_s21 = scalar_lea.sflag (!%p1554_p0), [#allocation3], %s1423_s8  ;;  %s301_s16 = scalar_lea.vmem (!%p1554_p0), [#allocation2], %s1426_s17 }
  0x7f   : > { %1138 = dma.done.wait (%p1555_p9), %s298_s21, 128  }
  0x80   : > { %1140 = vsyncadd (%p1555_p9), %s298_s21, 4294967168  ;;  %p1556_p11 = scmp.eq.s32.totalorder %s1245_s28, 0 }
  0x82   : > { %1142 = dma.done.wait (%p1556_p11), [#allocation6], 1024   ;;  %p1557_p8 = pmov %p1556_p11 }
  0x84   : > { %1144 = vsyncadd (%p1557_p8), [#allocation6], 4294966272  ;;  %p1558_p13 = pmov %p1557_p8 }
  0x85   : > { %p1559_p6 = pmov %p1557_p8 }
  0x86   : > { %1146 = dma.done.wait (%p1558_p13), [#allocation9], 512  }
  0x87   : > { %1148 = vsyncadd (%p1559_p6), [#allocation9], 4294966784  ;;  %v1179_v0 = vmov 0.0|0.0   ;;  %vm1180_vm0 = vmmov 0   ;;  %v1181_v1 = vmov 0.0   ;;  %v350_v2 = vld [vmem:[#allocation5] sm:$0xff] }
  0x88   : > { %844 = vmatprep.subr.bf16.mxu0 %v1179_v0  ;;  %819 = vmatprep.mubr.msk.f32.mxu0 %vm1180_vm0, %v1181_v1  ;;  %v351_v3 = vld [vmem:[#allocation5 + $0x8] sm:$0xff]  ;;  %v352_v4 = vld [vmem:[#allocation5 + $0x10] sm:$0xff]  ;;  %v353_v6 = vld [vmem:[#allocation5 + $0x18] sm:$0xff]  ;;  %vm361_vm1 = vcmask 261120   ;;  %s341_s11 = scalar_lea.vmem [#allocation10], %s1426_s17  ;;  %s792_s14 = sshll.u32 %s1245_s28, 7 }
  0x89   : > { %850 = vmatprep.subr.bf16.mxu1 %v1179_v0  ;;  %830 = vmatprep.mubr.msk.f32.mxu1 %vm1180_vm0, %v1181_v1  ;;  %v845_v5 = vpack.c.bf16 %v351_v3, %v350_v2  ;;  %v848_v7 = vpack.c.bf16 %v353_v6, %v352_v4  ;;  %v349_v8 = vld [vmem:[%s301_s16] sm:$0xff]  ;;  %v444_v9 = vld [vmem:[#allocation7] sm:$0xff]  ;;  %v445_v10 = vld [vmem:[#allocation7 + $0x8] sm:$0xff]  ;;  %s626_s13 = sshll.u32 %s341_s11, 4  ;;  %s1462_s29 = scalar_lea.hbm %s1539_s6, %s792_s14  ;;  %s627_s13 = int_to_ptr.vmem [resolvable:$true] %s626_s13 }
  0x8a   : > { %v446_v11 = vld [vmem:[#allocation7 + $0x10] sm:$0xff]  ;;  %v851_v12 = vpack.c.bf16 %v445_v10, %v444_v9  ;;  %v447_v13 = vld [vmem:[#allocation7 + $0x18] sm:$0xff]  ;;  %v529_v15 = vld [vmem:[#allocation8] sm:$0xff]  ;;  %s608_s12 = scalar_lea.sflag [#allocation4], %s1423_s8  ;;  %s1065_s21 = scalar_lea.vmem %s627_s13, 128 }
  0x8b   : > { %846 = vmatpush3.bf16.msra.mxu0 %v845_v5  ;;  %v854_v14 = vpack.c.bf16 %v447_v13, %v446_v11  ;;  %v530_v16 = vld [vmem:[#allocation8 + $0x8] sm:$0xff]  ;;  %v785_v18 = vld [vmem:[%s1535_s2] ss:$0 sm:$0xff]  ;;  %v532_v32 = vld [vmem:[#allocation8 + $0x18] sm:$0xff]  ;;  %p1066_p10 = scmp.ne.s32.totalorder %s627_s13, %s1065_s21  ;;  %s1182_s16 = smov [#allocation10]  }
  0x8c   : > { %847 = vmatprep.subr.bf16.mxu0 %v1179_v0  ;;  %852 = vmatpush3.bf16.msra.mxu1 %v851_v12  ;;  %v857_v17 = vpack.c.bf16 %v530_v16, %v529_v15  ;;  %v531_v31 = vld [vmem:[#allocation8 + $0x10] sm:$0xff]  ;;  %s1069_s30 = sshll.u32 %s1182_s16, 4  ;;  %s1070_s30 = int_to_ptr.vmem [resolvable:$false] %s1069_s30 }
  0x8d   : > { %853 = vmatprep.subr.bf16.mxu1 %v1179_v0  ;;  %v860_v33 = vpack.c.bf16 %v532_v32, %v531_v31  ;;  %v787_v34 = vld [vmem:[%s1537_s4] ss:$0 sm:$0xff]  ;;  %p1067_p3 = pnand %p1066_p10, %p1378_p5  ;;  %s1071_s9 = scalar_lea.vmem %s1070_s30, 256 }
  0x8e   : > { %p1072_p12 = scmp.lt.s32.totalorder %s627_s13, %s1070_s30  ;;  %p1073_p1 = scmp.lt.s32.totalorder %s1071_s9, %s1065_s21 }
  0x8f   : > { %849 = vmatpush3.bf16.msra.mxu0 %v848_v7  ;;  %p1068_p7 = pneg %p1067_p3 }
  0x90   : > { %856 = vmatprep.subr.bf16.mxu0 %v1179_v0  ;;  %855 = vmatpush3.bf16.msra.mxu1 %v854_v14  ;;  %p1074_p2 = por %p1073_p1, %p1072_p12 }
  0x92   : > { %820 = vmatmul.mubr.msk.f32.vlgmr.msra.gmra.mrb[0].mxu0 %vm361_vm1, %v349_v8  ;;  %p1075_p4 = pnand %p1074_p2, %p1068_p7 }
  0x93   : > { %841 = vmatprep.mubr.msk.f32.mxu0 %vm1180_vm0, %v1181_v1  ;;  %858 = vmatpush3.bf16.msra.mxu0 %v857_v17 }
  0x94   : > { %859 = vmatprep.subr.bf16.mxu0 %v1179_v0 }
  0x97   : > { %861 = vmatpush3.bf16.msra.mxu0 %v860_v33 }
 0x165   : > { %v431_v19 = vpop.f32.mrb[0].mxu0 }
 0x166   : > { %v432_v20 = vadd.f32 %v785_v18, %v431_v19  ;;  %v821_v21 = vpop.f32.mrb[1].mxu0 }
 0x168   : > { %v435_v22 = vmul.f32 %v432_v20, %v432_v20 }
 0x16a   : > { %v436_v23 = vmul.f32 %v435_v22, %v432_v20 }
 0x16c   : > { %v437_v24 = vmul.f32 0.044715, %v436_v23 }
 0x16e   : > { %v438_v25 = vadd.f32 %v437_v24, %v432_v20 }
 0x170   : > { %v439_v26 = vmul.f32 0.7978846, %v438_v25 }
 0x172   : > { %949 = vtanh.f32 %v439_v26 }
 0x17c   : > { %v950_v27 = vpop.eup %949 }
 0x17d   : > { %v441_v28 = vadd.f32 1.0, %v950_v27 }
 0x17f   : > { %v442_v29 = vmul.f32 0.5, %v441_v28 }
 0x181   : > { %v443_v30 = vmul.f32 %v442_v29, %v432_v20 }
 0x183   : > { %831 = vmatmul.mubr.msk.f32.vlgmr.msra.gmra.mrb[0].mxu1 %vm361_vm1, %v443_v30 }
 0x256   : > { %v524_v35 = vpop.f32.mrb[0].mxu1 }
 0x257   : > { %v525_v36 = vadd.f32 %v787_v34, %v524_v35  ;;  %v832_v37 = vpop.f32.mrb[1].mxu1 }
 0x259   : > { %842 = vmatmul.mubr.msk.f32.vlgmr.msra.gmra.mrb[2].mxu0 %vm361_vm1, %v525_v36  ;;  %528 = vst.msk [vmem:[%s341_s11] sm:$0xff] %vm361_vm1, %v525_v36 }
 0x25a   : > { %1078 = shalt.err (!%p1075_p4)
}
 0x25b   : > { %s1079_s23 = scalar_lea.hbm %s1462_s29, 128  ;;  %s1083_s20 = scalar_lea.hbm %s1539_s6, 256 }
 0x25c   : > { %p1080_p0 = scmp.ne.s32.totalorder %s1462_s29, %s1079_s23  ;;  %p1084_p8 = scmp.lt.u32.totalorder %s1462_s29, %s1539_s6 }
 0x25d   : > { %p1085_p13 = scmp.lt.u32.totalorder %s1083_s20, %s1079_s23  ;;  %p1087_p10 = scmp.lt.u32.totalorder %s1079_s23, %s1462_s29 }
 0x25e   : > { %p1081_p9 = pnand %p1080_p0, %p1378_p5 }
 0x25f   : > { %p1086_p6 = por %p1085_p13, %p1084_p8 }
 0x260   : > { %p1082_p11 = pneg %p1081_p9 }
 0x261   : > { %p1088_p3 = por %p1087_p10, %p1086_p6 }
 0x263   : > { %p1089_p7 = pnand %p1088_p3, %p1082_p11 }
 0x265   : > { %1092 = shalt.err (!%p1089_p7)
}
 0x266   : > { %876 = dma.vmem_to_hbm [thread:$0]  (%p1378_p5), %s627_s13, 128, %s1462_s29, %s608_s12  }
 0x267   : > { %s348_s21 = scalar_lea.vmem [#allocation11], %s1426_s17  ;;  %s1488_s11 = scalar_lea.hbm %s1540_s7, %s792_s14 }
 0x268   : > { %s639_s30 = sshll.u32 %s348_s21, 4  ;;  %s613_s23 = scalar_lea.sflag [#allocation12], %s1423_s8  ;;  %s1490_s30 = int_to_ptr.vmem [resolvable:$true] %s639_s30 }
 0x269   : > { %s1093_s20 = scalar_lea.vmem %s1490_s30, 128  ;;  %s1183_s28 = smov [#allocation11]  }
 0x26a   : > { %p1094_p12 = scmp.ne.s32.totalorder %s1490_s30, %s1093_s20  ;;  %s1097_s17 = sshll.u32 %s1183_s28, 4  ;;  %s1098_s17 = int_to_ptr.vmem [resolvable:$false] %s1097_s17 }
 0x26b   : > { %s1099_s14 = scalar_lea.vmem %s1098_s17, 256  ;;  %p1100_p4 = scmp.lt.s32.totalorder %s1490_s30, %s1098_s17 }
 0x26c   : > { %p1095_p1 = pnand %p1094_p12, %p1378_p5  ;;  %p1101_p0 = scmp.lt.s32.totalorder %s1099_s14, %s1093_s20 }
 0x26e   : > { %p1096_p2 = pneg %p1095_p1  ;;  %p1102_p9 = por %p1101_p0, %p1100_p4 }
 0x270   : > { %p1103_p11 = pnand %p1102_p9, %p1096_p2 }
 0x32c   : > { %v602_v38 = vpop.f32.mrb[2].mxu0 }
 0x32d   : > { %606 = vst.msk [vmem:[%s348_s21] sm:$0xff] %vm361_vm1, %v602_v38  ;;  %v843_v39 = vpop.f32.mrb[3].mxu0 }
 0x32e   : > { %1106 = shalt.err (!%p1103_p11)
}
 0x32f   : > { %s1107_s8 = scalar_lea.hbm %s1488_s11, 128  ;;  %s1111_s12 = scalar_lea.hbm %s1540_s7, 256 }
 0x330   : > { %p1108_p8 = scmp.ne.s32.totalorder %s1488_s11, %s1107_s8  ;;  %p1112_p10 = scmp.lt.u32.totalorder %s1488_s11, %s1540_s7 }
 0x331   : > { %p1113_p3 = scmp.lt.u32.totalorder %s1111_s12, %s1107_s8  ;;  %p1115_p12 = scmp.lt.u32.totalorder %s1107_s8, %s1488_s11 }
 0x332   : > { %p1109_p13 = pnand %p1108_p8, %p1378_p5 }
 0x333   : > { %p1114_p7 = por %p1113_p3, %p1112_p10 }
 0x334   : > { %p1110_p6 = pneg %p1109_p13 }
 0x335   : > { %p1116_p1 = por %p1115_p12, %p1114_p7 }
 0x337   : > { %p1117_p2 = pnand %p1116_p1, %p1110_p6 }
 0x339   : > { %1120 = shalt.err (!%p1117_p2)
}
 0x33a   : > { %877 = dma.vmem_to_hbm [thread:$0]  (%p1378_p5), %s1490_s30, 128, %s1488_s11, %s613_s23  }
 0x33b PF: > { %s1560_s21 = sld [smem:[#allocation18_spill]]  ;;  %s651_s9 = sand.u32 1, %s1159_s24  }
 0x33c   : > { %p1562_p0 = scmp.ge.s32.totalorder %s1171_s27, 2  ;;  %s652_s10 = scalar_lea.sflag [#allocation4], %s651_s9 }
 0x341   : > { %p1561_p4 = scmp.ne.s32.totalorder %s1560_s21, 0 }
 0x343   : > { %p895_p9 = pnand %p1562_p0, %p1561_p4 }
 0x345   : > { %1150 = dma.done.wait (!%p895_p9), %s652_s10, 128  }
 0x346   : > { %1152 = vsyncadd (!%p895_p9), %s652_s10, 4294967168  ;;  %s661_s20 = scalar_lea.sflag [#allocation12], %s651_s9 }
 0x347   : > { %1154 = dma.done.wait (!%p895_p9), %s661_s20, 128  }
 0x348   : > { %1156 = vsyncadd (!%p895_p9), %s661_s20, 4294967168  ;;  %p26_p5 = scmp.ge.s32.totalorder %s1364_s22, 4   ;;  %s1563_s24 = smov %s1163_s25 }
 0x349   : > { %s1564_s25 = smov %s1167_s26  ;;  %s1565_s26 = smov %s1374_s18 }
 0x34a   : > { %s1566_s27 = smov %s1364_s22  ;;  %28 = sbr.rel (!%p26_p5) target bundleno = 9 (0x9), region = 118 }
 0x351   :  { %666 = vsyncpa [#allocation3], 1 }
 0x352   :  { %668 = vsyncpa [#allocation3 + $0x1], 1 }
 0x353   :  { %669 = vsyncpa [#allocation6], 1 }
 0x354   :  { %670 = vsyncpa [#allocation9], 1 }
 0x355   :  { %671 = vsyncpa [#allocation4], 1 }
 0x356   :  { %673 = vsyncpa [#allocation4 + $0x1], 1 }
 0x357   :  { %674 = vsyncpa [#allocation12], 1 }
 0x358   :  { %676 = vsyncpa [#allocation12 + $0x1], 1 }

</bundles_post_ra>
